<compile_context>
chip_gen: v7x
topology: tpu7x:2x2x1
jax: 0.10.0
libtpu: 0.0.40
codegen_flags: <defaults>
</compile_context>

<pallas_src>
import functools

import numpy as np
import jax
import jax.numpy as jnp
from jax.experimental import pallas as pl
from jax.experimental.pallas import tpu as pltpu


# ----------------------------------------------------------------------------
# Model dims (real) and lane-padded dims (everything 128-dense)
# ----------------------------------------------------------------------------
PATCH = 4
IN_CH = 3
DIM = 32                       # real trunk channels
HIDDEN = 128                   # 4x MLP expansion (already lane-dense)
NUM_CLASSES = 10               # BDD100K det classes
HEAD_OUT = NUM_CLASSES + 4     # class logits + box deltas

LANE = 128
K_STEM = PATCH * PATCH * IN_CH  # 48 real patch features
K_STEM_P = LANE                 # padded to 128 (zero columns)
DIM_P = LANE                    # trunk channels padded 32 -> 128
OUT_P = LANE                    # head outputs padded 14 -> 128


# ----------------------------------------------------------------------------
# Fused Pallas kernel
# ----------------------------------------------------------------------------
def _layernorm_f32(x, g, b, d_real, eps):
    """LayerNorm over the first d_real lanes.  Padded lanes of x must be zero;
    gamma/beta are zero-padded, so padded lanes stay exactly zero on output."""
    inv_d = jnp.float32(1.0 / d_real)
    mu = jnp.sum(x, axis=-1, keepdims=True) * inv_d          # zeros don't bias the sum
    ex2 = jnp.sum(x * x, axis=-1, keepdims=True) * inv_d
    var = ex2 - mu * mu
    inv = jax.lax.rsqrt(var + eps)
    return (x - mu) * inv * g.astype(jnp.float32) + b.astype(jnp.float32)


def _fused_trunk_kernel(
    patches_ref,
    stem_w_ref, stem_b_ref,
    ln0_g_ref, ln0_b_ref,
    ln1_g_ref, ln1_b_ref,
    mlp1_w_ref, mlp1_b_ref,
    mlp2_w_ref, mlp2_b_ref,
    head_w_ref, head_b_ref,
    out_ref,
    *, dim_real, eps,
):
    f32 = jnp.float32
    bf16 = jnp.bfloat16

    # --- patchify stem (4x4/stride-4 conv as matmul) + LayerNorm
    x = jnp.dot(patches_ref[...], stem_w_ref[...], preferred_element_type=f32)
    x = x + stem_b_ref[...].astype(f32)
    tok = _layernorm_f32(x, ln0_g_ref[...], ln0_b_ref[...], dim_real, eps)

    # --- ConvNeXt-style block: LN -> pwconv(4x, GELU) -> pwconv -> +residual
    # TODO(synk): the 7x7 depthwise conv of the real ConvNeXt block is omitted.
    h = _layernorm_f32(tok, ln1_g_ref[...], ln1_b_ref[...], dim_real, eps)
    h = jnp.dot(h.astype(bf16), mlp1_w_ref[...], preferred_element_type=f32)
    # NOTE: tanh-approx GELU (PyTorch nn.GELU default is exact erf; bf16-level diff).
    h = jax.nn.gelu(h + mlp1_b_ref[...].astype(f32), approximate=True)
    t = jnp.dot(h.astype(bf16), mlp2_w_ref[...], preferred_element_type=f32)
    tok = t + mlp2_b_ref[...].astype(f32) + tok               # residual in f32

    # --- dense detection head (lane-padded to 128; wrapper slices back to 14)
    # TODO(synk): cascade-RCNN proposals / RoIAlign / NMS have no dense Pallas
    # equivalent; a dense per-location prediction map is returned instead.
    o = jnp.dot(tok.astype(bf16), head_w_ref[...], preferred_element_type=f32)
    o = o + head_b_ref[...].astype(f32)
    out_ref[...] = o.astype(out_ref.dtype)


# ----------------------------------------------------------------------------
# Wrapper
# ----------------------------------------------------------------------------
def _choose_tm(m, cap=512):
    """Largest row tile <= cap that divides m and leaves >=2 grid steps
    (amortises per-step overhead while keeping both v7x TensorCores busy)."""
    for tm in (512, 256, 128, 64, 32, 16, 8):
        if tm <= cap and tm <= m and m % tm == 0 and m // tm >= 2:
            return tm
    return m


def fused_trunk(patches_p, params, *, eps=1e-6):
    m, kp = patches_p.shape
    assert kp == K_STEM_P
    tm = _choose_tm(m)
    grid = (m // tm,)

    row = lambda i: (i, 0)    # tiled over tokens
    full = lambda i: (0, 0)   # weights / biases resident across all steps

    in_specs = [
        pl.BlockSpec((tm, K_STEM_P), row),          # padded patch features
        pl.BlockSpec((K_STEM_P, DIM_P), full),      # stem_w
        pl.BlockSpec((1, DIM_P), full),             # stem_b
        pl.BlockSpec((1, DIM_P), full),             # ln0_g
        pl.BlockSpec((1, DIM_P), full),             # ln0_b
        pl.BlockSpec((1, DIM_P), full),             # ln1_g
        pl.BlockSpec((1, DIM_P), full),             # ln1_b
        pl.BlockSpec((DIM_P, HIDDEN), full),        # mlp1_w
        pl.BlockSpec((1, HIDDEN), full),            # mlp1_b
        pl.BlockSpec((HIDDEN, DIM_P), full),        # mlp2_w
        pl.BlockSpec((1, DIM_P), full),             # mlp2_b
        pl.BlockSpec((DIM_P, OUT_P), full),         # head_w
        pl.BlockSpec((1, OUT_P), full),             # head_b
    ]
    return pl.pallas_call(
        functools.partial(_fused_trunk_kernel, dim_real=DIM, eps=eps),
        out_shape=jax.ShapeDtypeStruct((m, OUT_P), jnp.bfloat16),
        grid=grid,
        in_specs=in_specs,
        out_specs=pl.BlockSpec((tm, OUT_P), row),   # 128-dense: unmasked stores
        compiler_params=pltpu.CompilerParams(
            dimension_semantics=("parallel",),
        ),
    )(
        patches_p,
        params["stem_w"], params["stem_b"],
        params["ln0_g"], params["ln0_b"],
        params["ln1_g"], params["ln1_b"],
        params["mlp1_w"], params["mlp1_b"],
        params["mlp2_w"], params["mlp2_b"],
        params["head_w"], params["head_b"],
    )


# ----------------------------------------------------------------------------
# Params (lane-padded at init time; padding is free at runtime)
# ----------------------------------------------------------------------------
def init_params(key):
    ks = jax.random.split(key, 4)

    def dense(k, fan_in, fan_out, k_pad, n_pad):
        w = jax.random.normal(k, (fan_in, fan_out), jnp.float32) / np.sqrt(fan_in)
        w = jnp.pad(w, ((0, k_pad - fan_in), (0, n_pad - fan_out)))
        b = jnp.zeros((1, n_pad), jnp.float32)
        return w.astype(jnp.bfloat16), b.astype(jnp.bfloat16)

    def ln(n_real, n_pad):
        g = jnp.pad(jnp.ones((1, n_real), jnp.float32), ((0, 0), (0, n_pad - n_real)))
        b = jnp.zeros((1, n_pad), jnp.float32)
        return g.astype(jnp.bfloat16), b.astype(jnp.bfloat16)

    p = {}
    p["stem_w"], p["stem_b"] = dense(ks[0], K_STEM, DIM, K_STEM_P, DIM_P)
    p["ln0_g"], p["ln0_b"] = ln(DIM, DIM_P)
    p["ln1_g"], p["ln1_b"] = ln(DIM, DIM_P)
    p["mlp1_w"], p["mlp1_b"] = dense(ks[1], DIM, HIDDEN, DIM_P, HIDDEN)
    p["mlp2_w"], p["mlp2_b"] = dense(ks[2], HIDDEN, DIM, HIDDEN, DIM_P)
    p["head_w"], p["head_b"] = dense(ks[3], DIM, HEAD_OUT, DIM_P, OUT_P)
    return p


# ----------------------------------------------------------------------------
# Forward
# ----------------------------------------------------------------------------
def _patchify(img):
    """NCHW -> flattened non-overlapping 4x4 patches, zero-padded to 128 lanes."""
    n, c, h, w = img.shape
    hp, wp = h // PATCH, w // PATCH
    # TODO(synk): at real BDD100K resolution fold this patchify transpose into
    # the stem DMA (index_map over patch rows) instead of materialising in XLA.
    x = jnp.transpose(img, (0, 2, 3, 1))                       # NHWC
    x = x.reshape(n, hp, PATCH, wp, PATCH, c)
    x = jnp.transpose(x, (0, 1, 3, 2, 4, 5))                   # N,hp,wp,P,P,C
    patches = x.reshape(n * hp * wp, PATCH * PATCH * c)
    patches_p = jnp.pad(patches, ((0, 0), (0, K_STEM_P - PATCH * PATCH * c)))
    return patches_p, hp, wp


@jax.jit
def label_det_forward(img, params):
    """img: (N, C, H, W) NCHW (PyTorch convention) -> (N, Hp*Wp, HEAD_OUT)."""
    n = img.shape[0]
    patches_p, hp, wp = _patchify(img)
    pred_p = fused_trunk(patches_p, params)          # (M, 128) lane-dense
    pred = pred_p[:, :HEAD_OUT]                      # slice padded lanes back to 14
    return pred.reshape(n, hp * wp, HEAD_OUT)


# ----------------------------------------------------------------------------
# Pure-JAX reference (mirrors the kernel's bf16 casts) for a correctness check
# ----------------------------------------------------------------------------
def _reference_forward(img, params, eps=1e-6):
    f32 = jnp.float32
    bf16 = jnp.bfloat16
    n = img.shape[0]
    patches_p, hp, wp = _patchify(img)

    def ln(x, g, b):
        mu = jnp.sum(x, axis=-1, keepdims=True) / DIM
        ex2 = jnp.sum(x * x, axis=-1, keepdims=True) / DIM
        inv = jax.lax.rsqrt(ex2 - mu * mu + eps)
        return (x - mu) * inv * g.astype(f32) + b.astype(f32)

    x = patches_p.astype(f32) @ params["stem_w"].astype(f32) + params["stem_b"].astype(f32)
    tok = ln(x, params["ln0_g"], params["ln0_b"])
    h = ln(tok, params["ln1_g"], params["ln1_b"])
    h = h.astype(bf16).astype(f32) @ params["mlp1_w"].astype(f32) + params["mlp1_b"].astype(f32)
    h = jax.nn.gelu(h, approximate=True)
    t = h.astype(bf16).astype(f32) @ params["mlp2_w"].astype(f32) + params["mlp2_b"].astype(f32)
    tok = t + tok
    o = tok.astype(bf16).astype(f32) @ params["head_w"].astype(f32) + params["head_b"].astype(f32)
    o = o.astype(bf16)[:, :HEAD_OUT]
    return o.reshape(n, hp * wp, HEAD_OUT)


# ----------------------------------------------------------------------------
if __name__ == "__main__":
    root = jax.random.PRNGKey(0)
    k_img, k_par = jax.random.split(root)

    img = jax.random.normal(k_img, (2, IN_CH, 32, 32), jnp.float32).astype(jnp.bfloat16)
    params = init_params(k_par)

    pred = label_det_forward(img, params)
    jax.block_until_ready(pred)

    assert pred.shape == (2, (32 // PATCH) * (32 // PATCH), HEAD_OUT), pred.shape
    assert jnp.all(jnp.isfinite(pred.astype(jnp.float32)))

    ref = _reference_forward(img, params)
    np.testing.assert_allclose(
        np.asarray(pred, np.float32), np.asarray(ref, np.float32),
        atol=5e-2, rtol=5e-2,
    )
    print("KERNEL_OK")
</pallas_src>

<mosaic_0001>
module attributes {stable_mosaic.version = 11 : i64} {
  func.func @_fused_trunk_kernel(%arg0: i32, %arg1: memref<64x128xbf16, #tpu.memory_space<vmem>>, %arg2: memref<128x128xbf16, #tpu.memory_space<vmem>>, %arg3: memref<1x128xbf16, #tpu.memory_space<vmem>>, %arg4: memref<1x128xbf16, #tpu.memory_space<vmem>>, %arg5: memref<1x128xbf16, #tpu.memory_space<vmem>>, %arg6: memref<1x128xbf16, #tpu.memory_space<vmem>>, %arg7: memref<1x128xbf16, #tpu.memory_space<vmem>>, %arg8: memref<128x128xbf16, #tpu.memory_space<vmem>>, %arg9: memref<1x128xbf16, #tpu.memory_space<vmem>>, %arg10: memref<128x128xbf16, #tpu.memory_space<vmem>>, %arg11: memref<1x128xbf16, #tpu.memory_space<vmem>>, %arg12: memref<128x128xbf16, #tpu.memory_space<vmem>>, %arg13: memref<1x128xbf16, #tpu.memory_space<vmem>>, %arg14: memref<64x128xbf16, #tpu.memory_space<vmem>>) attributes {dimension_semantics = [#tpu.dimension_semantics<parallel>], iteration_bounds = array<i64: 2>, scalar_prefetch = 0 : i64, scratch_operands = 0 : i64, tpu.core_type = #tpu.core_type<tc>, window_params = [{transform_indices = @transform_0, window_bounds = array<i64: 64, 128>}, {pipeline_mode = #tpu.pipeline_mode<synchronous>, transform_indices = @transform_1, window_bounds = array<i64: 128, 128>}, {pipeline_mode = #tpu.pipeline_mode<synchronous>, transform_indices = @transform_2, window_bounds = array<i64: 1, 128>}, {pipeline_mode = #tpu.pipeline_mode<synchronous>, transform_indices = @transform_3, window_bounds = array<i64: 1, 128>}, {pipeline_mode = #tpu.pipeline_mode<synchronous>, transform_indices = @transform_4, window_bounds = array<i64: 1, 128>}, {pipeline_mode = #tpu.pipeline_mode<synchronous>, transform_indices = @transform_5, window_bounds = array<i64: 1, 128>}, {pipeline_mode = #tpu.pipeline_mode<synchronous>, transform_indices = @transform_6, window_bounds = array<i64: 1, 128>}, {pipeline_mode = #tpu.pipeline_mode<synchronous>, transform_indices = @transform_7, window_bounds = array<i64: 128, 128>}, {pipeline_mode = #tpu.pipeline_mode<synchronous>, transform_indices = @transform_8, window_bounds = array<i64: 1, 128>}, {pipeline_mode = #tpu.pipeline_mode<synchronous>, transform_indices = @transform_9, window_bounds = array<i64: 128, 128>}, {pipeline_mode = #tpu.pipeline_mode<synchronous>, transform_indices = @transform_10, window_bounds = array<i64: 1, 128>}, {pipeline_mode = #tpu.pipeline_mode<synchronous>, transform_indices = @transform_11, window_bounds = array<i64: 128, 128>}, {pipeline_mode = #tpu.pipeline_mode<synchronous>, transform_indices = @transform_12, window_bounds = array<i64: 1, 128>}, {transform_indices = @transform_13, window_bounds = array<i64: 64, 128>}]} {
    %c0 = arith.constant 0 : index
    %c0_0 = arith.constant 0 : index
    %0 = vector.load %arg1[%c0, %c0_0] : memref<64x128xbf16, #tpu.memory_space<vmem>>, vector<64x128xbf16>
    %c0_1 = arith.constant 0 : index
    %c0_2 = arith.constant 0 : index
    %1 = vector.load %arg2[%c0_1, %c0_2] : memref<128x128xbf16, #tpu.memory_space<vmem>>, vector<128x128xbf16>
    %cst = arith.constant dense<0.000000e+00> : vector<64x128xf32>
    %2 = tpu.matmul %0, %1, %cst {dimension_numbers = #tpu.dot_dimension_numbers<[1], [0], [0], [1], [0, 0, 1, 1], [], []>} : vector<64x128xbf16>, vector<128x128xbf16>, vector<64x128xf32> -> vector<64x128xf32>
    %c0_3 = arith.constant 0 : index
    %c0_4 = arith.constant 0 : index
    %3 = vector.load %arg3[%c0_3, %c0_4] : memref<1x128xbf16, #tpu.memory_space<vmem>>, vector<1x128xbf16>
    %4 = arith.extf %3 : vector<1x128xbf16> to vector<1x128xf32>
    %5 = vector.broadcast %4 : vector<1x128xf32> to vector<64x128xf32>
    %6 = arith.addf %2, %5 : vector<64x128xf32>
    %c0_5 = arith.constant 0 : index
    %c0_6 = arith.constant 0 : index
    %7 = vector.load %arg4[%c0_5, %c0_6] : memref<1x128xbf16, #tpu.memory_space<vmem>>, vector<1x128xbf16>
    %c0_7 = arith.constant 0 : index
    %c0_8 = arith.constant 0 : index
    %8 = vector.load %arg5[%c0_7, %c0_8] : memref<1x128xbf16, #tpu.memory_space<vmem>>, vector<1x128xbf16>
    %cst_9 = arith.constant dense<0.000000e+00> : vector<64xf32>
    %9 = vector.multi_reduction <add>, %6, %cst_9 [1] : vector<64x128xf32> to vector<64xf32>
    %10 = vector.shape_cast %9 : vector<64xf32> to vector<64x1xf32>
    %cst_10 = arith.constant 3.125000e-02 : f32
    %11 = vector.broadcast %cst_10 : f32 to vector<64x1xf32>
    %12 = arith.mulf %10, %11 : vector<64x1xf32>
    %13 = arith.mulf %6, %6 : vector<64x128xf32>
    %cst_11 = arith.constant dense<0.000000e+00> : vector<64xf32>
    %14 = vector.multi_reduction <add>, %13, %cst_11 [1] : vector<64x128xf32> to vector<64xf32>
    %15 = vector.shape_cast %14 : vector<64xf32> to vector<64x1xf32>
    %cst_12 = arith.constant 3.125000e-02 : f32
    %16 = vector.broadcast %cst_12 : f32 to vector<64x1xf32>
    %17 = arith.mulf %15, %16 : vector<64x1xf32>
    %18 = arith.mulf %12, %12 : vector<64x1xf32>
    %19 = arith.subf %17, %18 : vector<64x1xf32>
    %cst_13 = arith.constant 9.99999997E-7 : f32
    %20 = vector.broadcast %cst_13 : f32 to vector<64x1xf32>
    %21 = arith.addf %19, %20 : vector<64x1xf32>
    %22 = math.rsqrt %21 : vector<64x1xf32>
    %23 = vector.broadcast %12 : vector<64x1xf32> to vector<64x128xf32>
    %24 = arith.subf %6, %23 : vector<64x128xf32>
    %25 = vector.broadcast %22 : vector<64x1xf32> to vector<64x128xf32>
    %26 = arith.mulf %24, %25 : vector<64x128xf32>
    %27 = arith.extf %7 : vector<1x128xbf16> to vector<1x128xf32>
    %28 = vector.broadcast %27 : vector<1x128xf32> to vector<64x128xf32>
    %29 = arith.mulf %26, %28 : vector<64x128xf32>
    %30 = arith.extf %8 : vector<1x128xbf16> to vector<1x128xf32>
    %31 = vector.broadcast %30 : vector<1x128xf32> to vector<64x128xf32>
    %32 = arith.addf %29, %31 : vector<64x128xf32>
    %c0_14 = arith.constant 0 : index
    %c0_15 = arith.constant 0 : index
    %33 = vector.load %arg6[%c0_14, %c0_15] : memref<1x128xbf16, #tpu.memory_space<vmem>>, vector<1x128xbf16>
    %c0_16 = arith.constant 0 : index
    %c0_17 = arith.constant 0 : index
    %34 = vector.load %arg7[%c0_16, %c0_17] : memref<1x128xbf16, #tpu.memory_space<vmem>>, vector<1x128xbf16>
    %cst_18 = arith.constant dense<0.000000e+00> : vector<64xf32>
    %35 = vector.multi_reduction <add>, %32, %cst_18 [1] : vector<64x128xf32> to vector<64xf32>
    %36 = vector.shape_cast %35 : vector<64xf32> to vector<64x1xf32>
    %cst_19 = arith.constant 3.125000e-02 : f32
    %37 = vector.broadcast %cst_19 : f32 to vector<64x1xf32>
    %38 = arith.mulf %36, %37 : vector<64x1xf32>
    %39 = arith.mulf %32, %32 : vector<64x128xf32>
    %cst_20 = arith.constant dense<0.000000e+00> : vector<64xf32>
    %40 = vector.multi_reduction <add>, %39, %cst_20 [1] : vector<64x128xf32> to vector<64xf32>
    %41 = vector.shape_cast %40 : vector<64xf32> to vector<64x1xf32>
    %cst_21 = arith.constant 3.125000e-02 : f32
    %42 = vector.broadcast %cst_21 : f32 to vector<64x1xf32>
    %43 = arith.mulf %41, %42 : vector<64x1xf32>
    %44 = arith.mulf %38, %38 : vector<64x1xf32>
    %45 = arith.subf %43, %44 : vector<64x1xf32>
    %cst_22 = arith.constant 9.99999997E-7 : f32
    %46 = vector.broadcast %cst_22 : f32 to vector<64x1xf32>
    %47 = arith.addf %45, %46 : vector<64x1xf32>
    %48 = math.rsqrt %47 : vector<64x1xf32>
    %49 = vector.broadcast %38 : vector<64x1xf32> to vector<64x128xf32>
    %50 = arith.subf %32, %49 : vector<64x128xf32>
    %51 = vector.broadcast %48 : vector<64x1xf32> to vector<64x128xf32>
    %52 = arith.mulf %50, %51 : vector<64x128xf32>
    %53 = arith.extf %33 : vector<1x128xbf16> to vector<1x128xf32>
    %54 = vector.broadcast %53 : vector<1x128xf32> to vector<64x128xf32>
    %55 = arith.mulf %52, %54 : vector<64x128xf32>
    %56 = arith.extf %34 : vector<1x128xbf16> to vector<1x128xf32>
    %57 = vector.broadcast %56 : vector<1x128xf32> to vector<64x128xf32>
    %58 = arith.addf %55, %57 : vector<64x128xf32>
    %59 = arith.truncf %58 : vector<64x128xf32> to vector<64x128xbf16>
    %c0_23 = arith.constant 0 : index
    %c0_24 = arith.constant 0 : index
    %60 = vector.load %arg8[%c0_23, %c0_24] : memref<128x128xbf16, #tpu.memory_space<vmem>>, vector<128x128xbf16>
    %cst_25 = arith.constant dense<0.000000e+00> : vector<64x128xf32>
    %61 = tpu.matmul %59, %60, %cst_25 {dimension_numbers = #tpu.dot_dimension_numbers<[1], [0], [0], [1], [0, 0, 1, 1], [], []>} : vector<64x128xbf16>, vector<128x128xbf16>, vector<64x128xf32> -> vector<64x128xf32>
    %c0_26 = arith.constant 0 : index
    %c0_27 = arith.constant 0 : index
    %62 = vector.load %arg9[%c0_26, %c0_27] : memref<1x128xbf16, #tpu.memory_space<vmem>>, vector<1x128xbf16>
    %63 = arith.extf %62 : vector<1x128xbf16> to vector<1x128xf32>
    %64 = vector.broadcast %63 : vector<1x128xf32> to vector<64x128xf32>
    %65 = arith.addf %61, %64 : vector<64x128xf32>
    %66 = arith.mulf %65, %65 : vector<64x128xf32>
    %67 = arith.mulf %65, %66 : vector<64x128xf32>
    %cst_28 = arith.constant 4.471500e-02 : f32
    %68 = vector.broadcast %cst_28 : f32 to vector<64x128xf32>
    %69 = arith.mulf %68, %67 : vector<64x128xf32>
    %70 = arith.addf %65, %69 : vector<64x128xf32>
    %cst_29 = arith.constant 0.797884583 : f32
    %71 = vector.broadcast %cst_29 : f32 to vector<64x128xf32>
    %72 = arith.mulf %71, %70 : vector<64x128xf32>
    %73 = math.tanh %72 : vector<64x128xf32>
    %cst_30 = arith.constant 1.000000e+00 : f32
    %74 = vector.broadcast %cst_30 : f32 to vector<64x128xf32>
    %75 = arith.addf %74, %73 : vector<64x128xf32>
    %cst_31 = arith.constant 5.000000e-01 : f32
    %76 = vector.broadcast %cst_31 : f32 to vector<64x128xf32>
    %77 = arith.mulf %76, %75 : vector<64x128xf32>
    %78 = arith.mulf %65, %77 : vector<64x128xf32>
    %79 = arith.truncf %78 : vector<64x128xf32> to vector<64x128xbf16>
    %c0_32 = arith.constant 0 : index
    %c0_33 = arith.constant 0 : index
    %80 = vector.load %arg10[%c0_32, %c0_33] : memref<128x128xbf16, #tpu.memory_space<vmem>>, vector<128x128xbf16>
    %cst_34 = arith.constant dense<0.000000e+00> : vector<64x128xf32>
    %81 = tpu.matmul %79, %80, %cst_34 {dimension_numbers = #tpu.dot_dimension_numbers<[1], [0], [0], [1], [0, 0, 1, 1], [], []>} : vector<64x128xbf16>, vector<128x128xbf16>, vector<64x128xf32> -> vector<64x128xf32>
    %c0_35 = arith.constant 0 : index
    %c0_36 = arith.constant 0 : index
    %82 = vector.load %arg11[%c0_35, %c0_36] : memref<1x128xbf16, #tpu.memory_space<vmem>>, vector<1x128xbf16>
    %83 = arith.extf %82 : vector<1x128xbf16> to vector<1x128xf32>
    %84 = vector.broadcast %83 : vector<1x128xf32> to vector<64x128xf32>
    %85 = arith.addf %81, %84 : vector<64x128xf32>
    %86 = arith.addf %85, %32 : vector<64x128xf32>
    %87 = arith.truncf %86 : vector<64x128xf32> to vector<64x128xbf16>
    %c0_37 = arith.constant 0 : index
    %c0_38 = arith.constant 0 : index
    %88 = vector.load %arg12[%c0_37, %c0_38] : memref<128x128xbf16, #tpu.memory_space<vmem>>, vector<128x128xbf16>
    %cst_39 = arith.constant dense<0.000000e+00> : vector<64x128xf32>
    %89 = tpu.matmul %87, %88, %cst_39 {dimension_numbers = #tpu.dot_dimension_numbers<[1], [0], [0], [1], [0, 0, 1, 1], [], []>} : vector<64x128xbf16>, vector<128x128xbf16>, vector<64x128xf32> -> vector<64x128xf32>
    %c0_40 = arith.constant 0 : index
    %c0_41 = arith.constant 0 : index
    %90 = vector.load %arg13[%c0_40, %c0_41] : memref<1x128xbf16, #tpu.memory_space<vmem>>, vector<1x128xbf16>
    %91 = arith.extf %90 : vector<1x128xbf16> to vector<1x128xf32>
    %92 = vector.broadcast %91 : vector<1x128xf32> to vector<64x128xf32>
    %93 = arith.addf %89, %92 : vector<64x128xf32>
    %94 = arith.truncf %93 : vector<64x128xf32> to vector<64x128xbf16>
    %c0_42 = arith.constant 0 : index
    %c0_43 = arith.constant 0 : index
    %95 = vector.load %arg14[%c0_42, %c0_43] : memref<64x128xbf16, #tpu.memory_space<vmem>>, vector<64x128xbf16>
    tpu.vector_store %arg14[%c0_42, %c0_43], %94 {strides = array<i32>} : memref<64x128xbf16, #tpu.memory_space<vmem>>, vector<64x128xbf16>,
    return
  }
  func.func @transform_0(%arg0: i32) -> (i32, i32) {
    %c0_i32 = arith.constant 0 : i32
    %c0_i32_0 = arith.constant 0 : i32
    return %arg0, %c0_i32 : i32, i32
  }
  func.func @transform_1(%arg0: i32) -> (i32, i32) {
    %c0_i32 = arith.constant 0 : i32
    %c0_i32_0 = arith.constant 0 : i32
    %c0_i32_1 = arith.constant 0 : i32
    return %c0_i32, %c0_i32_0 : i32, i32
  }
  func.func @transform_2(%arg0: i32) -> (i32, i32) {
    %c0_i32 = arith.constant 0 : i32
    %c0_i32_0 = arith.constant 0 : i32
    %c0_i32_1 = arith.constant 0 : i32
    return %c0_i32, %c0_i32_0 : i32, i32
  }
  func.func @transform_3(%arg0: i32) -> (i32, i32) {
    %c0_i32 = arith.constant 0 : i32
    %c0_i32_0 = arith.constant 0 : i32
    %c0_i32_1 = arith.constant 0 : i32
    return %c0_i32, %c0_i32_0 : i32, i32
  }
  func.func @transform_4(%arg0: i32) -> (i32, i32) {
    %c0_i32 = arith.constant 0 : i32
    %c0_i32_0 = arith.constant 0 : i32
    %c0_i32_1 = arith.constant 0 : i32
    return %c0_i32, %c0_i32_0 : i32, i32
  }
  func.func @transform_5(%arg0: i32) -> (i32, i32) {
    %c0_i32 = arith.constant 0 : i32
    %c0_i32_0 = arith.constant 0 : i32
    %c0_i32_1 = arith.constant 0 : i32
    return %c0_i32, %c0_i32_0 : i32, i32
  }
  func.func @transform_6(%arg0: i32) -> (i32, i32) {
    %c0_i32 = arith.constant 0 : i32
    %c0_i32_0 = arith.constant 0 : i32
    %c0_i32_1 = arith.constant 0 : i32
    return %c0_i32, %c0_i32_0 : i32, i32
  }
  func.func @transform_7(%arg0: i32) -> (i32, i32) {
    %c0_i32 = arith.constant 0 : i32
    %c0_i32_0 = arith.constant 0 : i32
    %c0_i32_1 = arith.constant 0 : i32
    return %c0_i32, %c0_i32_0 : i32, i32
  }
  func.func @transform_8(%arg0: i32) -> (i32, i32) {
    %c0_i32 = arith.constant 0 : i32
    %c0_i32_0 = arith.constant 0 : i32
    %c0_i32_1 = arith.constant 0 : i32
    return %c0_i32, %c0_i32_0 : i32, i32
  }
  func.func @transform_9(%arg0: i32) -> (i32, i32) {
    %c0_i32 = arith.constant 0 : i32
    %c0_i32_0 = arith.constant 0 : i32
    %c0_i32_1 = arith.constant 0 : i32
    return %c0_i32, %c0_i32_0 : i32, i32
  }
  func.func @transform_10(%arg0: i32) -> (i32, i32) {
    %c0_i32 = arith.constant 0 : i32
    %c0_i32_0 = arith.constant 0 : i32
    %c0_i32_1 = arith.constant 0 : i32
    return %c0_i32, %c0_i32_0 : i32, i32
  }
  func.func @transform_11(%arg0: i32) -> (i32, i32) {
    %c0_i32 = arith.constant 0 : i32
    %c0_i32_0 = arith.constant 0 : i32
    %c0_i32_1 = arith.constant 0 : i32
    return %c0_i32, %c0_i32_0 : i32, i32
  }
  func.func @transform_12(%arg0: i32) -> (i32, i32) {
    %c0_i32 = arith.constant 0 : i32
    %c0_i32_0 = arith.constant 0 : i32
    %c0_i32_1 = arith.constant 0 : i32
    return %c0_i32, %c0_i32_0 : i32, i32
  }
  func.func @transform_13(%arg0: i32) -> (i32, i32) {
    %c0_i32 = arith.constant 0 : i32
    %c0_i32_0 = arith.constant 0 : i32
    return %arg0, %c0_i32 : i32, i32
  }
}

</mosaic_0001>

<bundles_post_ra>
// kernel: label_det_forward.1
= control target key start
LH: loop header
LB: loop body
LE: loop exit
PB: predicated region body
PF: predicated region fallthrough
CT: control target
= control target key end

     0   :  { %s1869_s25 = smov 0   ;;  %s2217_s0 = inlined_call_operand.vmem [shape: bf16[128,128], index: 0, kind: input, shape index: {}]   ;;  %s2218_s1 = inlined_call_operand.vmem [shape: bf16[128,128], index: 1, kind: input, shape index: {}]   ;;  %s2219_s2 = inlined_call_operand.vmem [shape: bf16[1,128], index: 2, kind: input, shape index: {}]   ;;  %s2220_s3 = inlined_call_operand.vmem [shape: bf16[1,128], index: 3, kind: input, shape index: {}]   ;;  %s2221_s4 = inlined_call_operand.vmem [shape: bf16[1,128], index: 4, kind: input, shape index: {}]   ;;  %s2222_s5 = inlined_call_operand.vmem [shape: bf16[1,128], index: 5, kind: input, shape index: {}]   ;;  %s2223_s6 = inlined_call_operand.vmem [shape: bf16[1,128], index: 6, kind: input, shape index: {}]   ;;  %s2224_s7 = inlined_call_operand.vmem [shape: bf16[128,128], index: 7, kind: input, shape index: {}]   ;;  %s2225_s8 = inlined_call_operand.vmem [shape: bf16[1,128], index: 8, kind: input, shape index: {}]   ;;  %s2226_s9 = inlined_call_operand.vmem [shape: bf16[128,128], index: 9, kind: input, shape index: {}]   ;;  %s2227_s10 = inlined_call_operand.vmem [shape: bf16[1,128], index: 10, kind: input, shape index: {}]   ;;  %s2228_s11 = inlined_call_operand.vmem [shape: bf16[128,128], index: 11, kind: input, shape index: {}]   ;;  %s2229_s12 = inlined_call_operand.vmem [shape: bf16[1,128], index: 12, kind: input, shape index: {}]   ;;  %s2230_s13 = inlined_call_operand.vmem [shape: bf16[128,128], index: 13, kind: output, shape index: {}]  }
   0x1 LB: > { %s1469_s26 = sadd.s32 4294967295, %s1797_s25   ;;  %p1473_p0 = scmp.ge.s32.totalorder %s1797_s25, 1  ;;  %s1797_s25 = sphi %s1869_s25, %s23_s25  }
   0x2   : > { %p388_p1 = scmp.lt.s32.totalorder %s1797_s25, 3 }
   0x4   : > { %p389_p2 = pnand %p1473_p0, %p388_p1 }
   0x5   : > { %v1707_v0 = vld [vmem:[%s2218_s1] sm:$0xff] (!%p389_p2)   ;;  %s1474_s29 = sshll.u32 (!%p389_p2), %s1469_s26, 3  ;;  %v1708_v1 = vld [vmem:[%s2218_s1 + $0x8] sm:$0xff] (!%p389_p2)   ;;  %v1709_v2 = vld [vmem:[%s2218_s1 + $0x10] sm:$0xff] (!%p389_p2)   ;;  %v471_v12 = vlaneseq (!%p389_p2) }
   0x6   : > { %392 = sbr.rel (%p389_p2) target bundleno = 1314 (0x522), region = 72  ;;  %p433_p3 = scmp.lt.s32.totalorder (!%p389_p2), %s1474_s29, 15  ;;  %1603 = vmatprep.subr.bf16.mxu0 (!%p389_p2), %v1707_v0  ;;  %v1710_v3 = vld [vmem:[%s2218_s1 + $0x18] sm:$0xff] (!%p389_p2)   ;;  %v1711_v5 = vld [vmem:[%s2218_s1 + $0x20] sm:$0xff] (!%p389_p2)   ;;  %v1712_v6 = vld [vmem:[%s2218_s1 + $0x28] sm:$0xff] (!%p389_p2)  }
   0x7   : > { %1604 = vmatpush3.bf16.msra.mxu0 (!%p389_p2), %v1707_v0  ;;  %v1713_v7 = vld [vmem:[%s2218_s1 + $0x30] sm:$0xff] (!%p389_p2)   ;;  %v1714_v8 = vld [vmem:[%s2218_s1 + $0x38] sm:$0xff] (!%p389_p2)   ;;  %v472_v13 = vshrl.u32 (!%p389_p2), %v471_v12, 7  ;;  %v469_v14 = vld [vmem:[%s2219_s2] sm:$0x1] (!%p389_p2) }
   0x8   : > { %1605 = vmatprep.subr.bf16.mxu0 (!%p389_p2), %v1708_v1  ;;  %v470_v15 = vunpack.c.l.bf16 (!%p389_p2), %v469_v14 }
   0x9   : > { %v1912_v16 = vsub.s32 (!%p389_p2), 0, %v472_v13 }
   0xb   : > { %1606 = vmatpush3.bf16.msra.mxu0 (!%p389_p2), %v1708_v1  ;;  %v474_v17 = vrot.slane (!%p389_p2), %v470_v15, %v1912_v16 }
   0xc   : > { %1607 = vmatprep.subr.bf16.mxu0 (!%p389_p2), %v1709_v2 }
   0xd   : > { %s2232_s29 = smov (!%p433_p3, %s1474_s29), 15 }
   0xe   : > { %s1475_s17 = sshll.u32 %s2232_s29, 2 }
   0xf   : > { %s436_s20 = scalar_lea.vmem %s2217_s0, %s1475_s17  ;;  %1608 = vmatpush3.bf16.msra.mxu0 %v1709_v2  ;;  %v612_v2 = vld [vmem:[%s2220_s3] sm:$0x1]  ;;  %s442_s28 = scalar_lea.vmem %s2230_s13, %s1475_s17 }
  0x10   : > { %v1715_v4 = vld [vmem:[%s436_s20] sm:$0xff]   ;;  %1609 = vmatprep.subr.bf16.mxu0 %v1710_v3  ;;  %v1716_v9 = vld [vmem:[%s436_s20 + $0x8] sm:$0xff]   ;;  %v1717_v10 = vld [vmem:[%s436_s20 + $0x10] sm:$0xff]  }
  0x11   : > { %1619 = vmatprep.mubr.bf16.mxu0 %v1715_v4  ;;  %v1718_v11 = vld [vmem:[%s436_s20 + $0x18] sm:$0xff]  }
  0x13   : > { %1610 = vmatpush3.bf16.msra.mxu0 %v1710_v3 }
  0x14   : > { %1611 = vmatprep.subr.bf16.mxu0 %v1711_v5 }
  0x17   : > { %1612 = vmatpush3.bf16.msra.mxu0 %v1711_v5 }
  0x18   : > { %1613 = vmatprep.subr.bf16.mxu0 %v1712_v6 }
  0x1b   : > { %1614 = vmatpush3.bf16.msra.mxu0 %v1712_v6  ;;  %v613_v6 = vld [vmem:[%s2221_s4] sm:$0x1] }
  0x1c   : > { %1615 = vmatprep.subr.bf16.mxu0 %v1713_v7 }
  0x1f   : > { %1616 = vmatpush3.bf16.msra.mxu0 %v1713_v7 }
  0x20   : > { %1617 = vmatprep.subr.bf16.mxu0 %v1714_v8 }
  0x23   : > { %1618 = vmatpush3.bf16.msra.mxu0 %v1714_v8 }
  0x26   : > { %1620 = vmatmul.mubr.bf16.vlgmr.msra.gmra.mrb[0].mxu0 %v1716_v9  ;;  %v718_v9 = vunpack.c.l.bf16 %v612_v2 }
  0x27   : > { %1623 = vmatprep.mubr.bf16.mxu0 %v1717_v10 }
  0x2e   : > { %1624 = vmatmul.mubr.bf16.gmra.mrb[4].mxu0 %v1718_v11  ;;  %v731_v11 = vunpack.c.l.bf16 %v613_v6 }
  0xf9   : > { %v1621_v18 = vpop.f32.mrb[0].mxu0 }
  0xfa   : > { %v1915_v19 = vadd.f32 %v1621_v18, %v474_v17  ;;  %v581_v20 = vpop.f32.mrb[1].mxu0 }
  0xfb   : > { %v1917_v21 = vadd.f32 %v581_v20, %v474_v17  ;;  %v1622_v22 = vpop.f32.mrb[2].mxu0 }
  0xfc   : > { %618 = vadd.xlane.f32.xlu1 %v1915_v19  ;;  %v584_v23 = vpop.f32.mrb[3].mxu0  ;;  %v1921_v24 = vadd.f32 %v1622_v22, %v474_v17  ;;  %v640_v25 = vmul.f32 %v1915_v19, %v1915_v19 }
  0xfd   : > { %614 = vadd.xlane.f32.xlu0 %v1917_v21  ;;  %v1926_v27 = vadd.f32 %v584_v23, %v474_v17  ;;  %v638_v33 = vmul.f32 %v1917_v21, %v1917_v21  ;;  %v1978_v23 = vrot.slane %v731_v11, %v1912_v16 }
  0xfe   : > { %v641_v28 = vmul.f32 %v1921_v24, %v1921_v24 }
  0xff   : > { %v639_v32 = vmul.f32 %v1926_v27, %v1926_v27 }
 0x100   : > { %620 = vadd.xlane.f32.xlu1 %v1921_v24 }
 0x101   : > { %650 = vadd.xlane.f32.xlu0 %v640_v25  ;;  %v1625_v26 = vpop.f32.mrb[4].mxu0 }
 0x102   : > { %v597_v29 = vpop.f32.mrb[5].mxu0  ;;  %v1937_v35 = vadd.f32 %v1625_v26, %v474_v17 }
 0x103   : > { %v1626_v30 = vpop.f32.mrb[6].mxu0  ;;  %v1943_v37 = vadd.f32 %v597_v29, %v474_v17 }
 0x104   : > { %652 = vadd.xlane.f32.xlu1 %v641_v28  ;;  %v600_v31 = vpop.f32.mrb[7].mxu0  ;;  %v1935_v34 = vadd.f32 %v1626_v30, %v474_v17  ;;  %v644_v41 = vmul.f32 %v1937_v35, %v1937_v35 }
 0x105   : > { %616 = vadd.xlane.f32.xlu0 %v1926_v27  ;;  %v1941_v36 = vadd.f32 %v600_v31, %v474_v17  ;;  %v642_v39 = vmul.f32 %v1943_v37, %v1943_v37  ;;  %v1973_v17 = vrot.slane %v718_v9, %v1912_v16 }
 0x106   : > { %v645_v40 = vmul.f32 %v1935_v34, %v1935_v34 }
 0x107   : > { %v643_v38 = vmul.f32 %v1941_v36, %v1941_v36 }
 0x108   : > { %648 = vadd.xlane.f32.xlu1 %v639_v32 }
 0x109   : > { %646 = vadd.xlane.f32.xlu0 %v638_v33 }
 0x10c   : > { %628 = vadd.xlane.f32.xlu1 %v1935_v34 }
 0x10d   : > { %626 = vadd.xlane.f32.xlu0 %v1937_v35 }
 0x110   : > { %624 = vadd.xlane.f32.xlu1 %v1941_v36 }
 0x111   : > { %622 = vadd.xlane.f32.xlu0 %v1943_v37 }
 0x114   : > { %656 = vadd.xlane.f32.xlu1 %v643_v38 }
 0x115   : > { %654 = vadd.xlane.f32.xlu0 %v642_v39 }
 0x118   : > { %660 = vadd.xlane.f32.xlu1 %v645_v40 }
 0x119   : > { %658 = vadd.xlane.f32.xlu0 %v644_v41 }
 0x189   : > { %v619_v42 = vpop.xlane.xlu1 %618 }
 0x18a   : > { %v615_v43 = vpop.xlane.xlu0 %614  ;;  %v632_v44 = vmul.f32 0.03125, %v619_v42 }
 0x18b   : > { %v1955_v55 = vmul.f32 0.03125, %v615_v43 }
 0x18c   : > { %v672_v48 = vmul.f32 %v632_v44, %v632_v44  ;;  %v704_v13 = vsub.f32 %v1915_v19, %v632_v44 }
 0x18d   : > { %v621_v45 = vpop.xlane.xlu1 %620  ;;  %v670_v0 = vmul.f32 %v1955_v55, %v1955_v55  ;;  %v702_v42 = vsub.f32 %v1917_v21, %v1955_v55 }
 0x18e   : > { %v633_v46 = vmul.f32 0.03125, %v621_v45  ;;  %v651_v47 = vpop.xlane.xlu0 %650 }
 0x18f   : > { %v664_v49 = vmul.f32 0.03125, %v651_v47 }
 0x190   : > { %v673_v52 = vmul.f32 %v633_v46, %v633_v46  ;;  %v705_v25 = vsub.f32 %v1921_v24, %v633_v46 }
 0x191   : > { %v680_v50 = vsub.f32 %v664_v49, %v672_v48  ;;  %v653_v51 = vpop.xlane.xlu1 %652 }
 0x192   : > { %v665_v53 = vmul.f32 0.03125, %v653_v51  ;;  %v617_v54 = vpop.xlane.xlu0 %616 }
 0x193   : > { %v688_v56 = vadd.f32 1e-06, %v680_v50  ;;  %v1957_v57 = vmul.f32 0.03125, %v617_v54 }
 0x194   : > { %v681_v58 = vsub.f32 %v665_v53, %v673_v52 }
 0x195   : > { %1743 = vrsqrt.f32 %v688_v56  ;;  %v671_v59 = vmul.f32 %v1957_v57, %v1957_v57  ;;  %v649_v60 = vpop.xlane.xlu1 %648  ;;  %v703_v43 = vsub.f32 %v1926_v27, %v1957_v57 }
 0x196   : > { %v689_v61 = vadd.f32 1e-06, %v681_v58  ;;  %v663_v62 = vmul.f32 0.03125, %v649_v60  ;;  %v647_v63 = vpop.xlane.xlu0 %646 }
 0x197   : > { %v662_v1 = vmul.f32 0.03125, %v647_v63 }
 0x198   : > { %1745 = vrsqrt.f32 %v689_v61  ;;  %v679_v3 = vsub.f32 %v663_v62, %v671_v59 }
 0x199   : > { %v678_v4 = vsub.f32 %v662_v1, %v670_v0  ;;  %v629_v5 = vpop.xlane.xlu1 %628 }
 0x19a   : > { %v687_v7 = vadd.f32 1e-06, %v679_v3  ;;  %v627_v8 = vpop.xlane.xlu0 %626  ;;  %v1981_v26 = vmul.f32 0.03125, %v629_v5 }
 0x19b   : > { %v686_v10 = vadd.f32 1e-06, %v678_v4  ;;  %v636_v19 = vmul.f32 0.03125, %v627_v8 }
 0x19c   : > { %1747 = vrsqrt.f32 %v687_v7  ;;  %v677_v48 = vmul.f32 %v1981_v26, %v1981_v26  ;;  %v709_v7 = vsub.f32 %v1935_v34, %v1981_v26 }
 0x19d   : > { %1749 = vrsqrt.f32 %v686_v10  ;;  %v625_v12 = vpop.xlane.xlu1 %624  ;;  %v676_v49 = vmul.f32 %v636_v19, %v636_v19  ;;  %v708_v10 = vsub.f32 %v1937_v35, %v636_v19 }
 0x19e   : > { %v1970_v14 = vmul.f32 0.03125, %v625_v12  ;;  %v623_v15 = vpop.xlane.xlu0 %622 }
 0x19f   : > { %v1744_v18 = vpop.eup %1743  ;;  %v1975_v20 = vmul.f32 0.03125, %v623_v15 }
 0x1a0   : > { %v712_v22 = vmul.f32 %v1744_v18, %v704_v13  ;;  %v675_v30 = vmul.f32 %v1970_v14, %v1970_v14  ;;  %v707_v8 = vsub.f32 %v1941_v36, %v1970_v14  ;;  %v1719_v14 = vld [vmem:[%s2224_s7] sm:$0xff]  }
 0x1a1   : > { %v657_v28 = vpop.xlane.xlu1 %656  ;;  %v674_v38 = vmul.f32 %v1975_v20, %v1975_v20  ;;  %v706_v11 = vsub.f32 %v1943_v37, %v1975_v20  ;;  %1627 = vmatprep.subr.bf16.mxu1 %v1719_v14 }
 0x1a2   : > { %v1746_v29 = vpop.eup %1745  ;;  %v667_v31 = vmul.f32 0.03125, %v657_v28  ;;  %v655_v32 = vpop.xlane.xlu0 %654  ;;  %v725_v33 = vmul.f32 %v1973_v17, %v712_v22  ;;  %1628 = vmatpush3.bf16.msra.mxu1 %v1719_v14 }
 0x1a3   : > { %v666_v39 = vmul.f32 0.03125, %v655_v32  ;;  %v713_v40 = vmul.f32 %v1746_v29, %v705_v25  ;;  %v1722_v32 = vld [vmem:[%s2224_s7 + $0x18] sm:$0xff]  }
 0x1a4   : > { %v683_v41 = vsub.f32 %v667_v31, %v675_v30  ;;  %v1989_v24 = vadd.f32 %v1978_v23, %v725_v33  ;;  %v1723_v33 = vld [vmem:[%s2224_s7 + $0x20] sm:$0xff]  }
 0x1a5   : > { %v682_v44 = vsub.f32 %v666_v39, %v674_v38  ;;  %v661_v45 = vpop.xlane.xlu1 %660  ;;  %v726_v46 = vmul.f32 %v1973_v17, %v713_v40  ;;  %v1724_v38 = vld [vmem:[%s2224_s7 + $0x28] sm:$0xff]   ;;  %v1725_v39 = vld [vmem:[%s2224_s7 + $0x30] sm:$0xff]   ;;  %v1726_v40 = vld [vmem:[%s2224_s7 + $0x38] sm:$0xff]  }
 0x1a6   : > { %v1748_v47 = vpop.eup %1747  ;;  %v691_v50 = vadd.f32 1e-06, %v683_v41  ;;  %v669_v51 = vmul.f32 0.03125, %v661_v45  ;;  %750 = vadd.xlane.f32.xlu0 %v1989_v24  ;;  %v659_v52 = vpop.xlane.xlu0 %658  ;;  %v772_v2 = vmul.f32 %v1989_v24, %v1989_v24 }
 0x1a7   : > { %v1750_v53 = vpop.eup %1749  ;;  %v690_v54 = vadd.f32 1e-06, %v682_v44  ;;  %v668_v21 = vmul.f32 0.03125, %v659_v52  ;;  %v2000_v55 = vadd.f32 %v1978_v23, %v726_v46  ;;  %v711_v27 = vmul.f32 %v1748_v47, %v703_v43 }
 0x1a8   : > { %v685_v56 = vsub.f32 %v669_v51, %v677_v48  ;;  %v710_v57 = vmul.f32 %v1750_v53, %v702_v42  ;;  %1751 = vrsqrt.f32 %v691_v50 }
 0x1a9   : > { %v684_v58 = vsub.f32 %v668_v21, %v676_v49  ;;  %752 = vadd.xlane.f32.xlu1 %v2000_v55  ;;  %v724_v59 = vmul.f32 %v1973_v17, %v711_v27  ;;  %1753 = vrsqrt.f32 %v690_v54  ;;  %v773_v1 = vmul.f32 %v2000_v55, %v2000_v55 }
 0x1aa   : > { %v693_v60 = vadd.f32 1e-06, %v685_v56  ;;  %v723_v61 = vmul.f32 %v1973_v17, %v710_v57 }
 0x1ab   : > { %v692_v62 = vadd.f32 1e-06, %v684_v58  ;;  %v2006_v63 = vadd.f32 %v1978_v23, %v724_v59 }
 0x1ac   : > { %1755 = vrsqrt.f32 %v693_v60  ;;  %v2009_v0 = vadd.f32 %v1978_v23, %v723_v61 }
 0x1ad   : > { %1757 = vrsqrt.f32 %v692_v62  ;;  %748 = vadd.xlane.f32.xlu1 %v2006_v63  ;;  %v771_v3 = vmul.f32 %v2006_v63, %v2006_v63 }
 0x1ae   : > { %746 = vadd.xlane.f32.xlu0 %v2009_v0  ;;  %v770_v5 = vmul.f32 %v2009_v0, %v2009_v0 }
 0x1b1   : > { %784 = vadd.xlane.f32.xlu1 %v773_v1 }
 0x1b2   : > { %782 = vadd.xlane.f32.xlu0 %v772_v2  ;;  %v1752_v4 = vpop.eup %1751 }
 0x1b3   : > { %v1754_v6 = vpop.eup %1753  ;;  %v715_v15 = vmul.f32 %v1752_v4, %v707_v8 }
 0x1b4   : > { %v714_v22 = vmul.f32 %v1754_v6, %v706_v11  ;;  %v744_v6 = vld [vmem:[%s2222_s5] sm:$0x1] }
 0x1b5   : > { %780 = vadd.xlane.f32.xlu1 %v771_v3  ;;  %v728_v36 = vmul.f32 %v1973_v17, %v715_v15 }
 0x1b6   : > { %v1756_v9 = vpop.eup %1755  ;;  %778 = vadd.xlane.f32.xlu0 %v770_v5  ;;  %v727_v37 = vmul.f32 %v1973_v17, %v714_v22 }
 0x1b7   : > { %v1758_v12 = vpop.eup %1757  ;;  %v717_v13 = vmul.f32 %v1756_v9, %v709_v7  ;;  %v2044_v20 = vadd.f32 %v1978_v23, %v728_v36  ;;  %v745_v9 = vld [vmem:[%s2223_s6] sm:$0x1] }
 0x1b8   : > { %v716_v18 = vmul.f32 %v1758_v12, %v708_v10  ;;  %v2047_v28 = vadd.f32 %v1978_v23, %v727_v37  ;;  %v850_v10 = vunpack.c.l.bf16 %v744_v6 }
 0x1b9   : > { %v730_v25 = vmul.f32 %v1973_v17, %v717_v13  ;;  %v775_v29 = vmul.f32 %v2044_v20, %v2044_v20  ;;  %v863_v13 = vunpack.c.l.bf16 %v745_v9 }
 0x1ba   : > { %v729_v34 = vmul.f32 %v1973_v17, %v716_v18  ;;  %v1720_v17 = vld [vmem:[%s2224_s7 + $0x8] sm:$0xff]   ;;  %v774_v19 = vmul.f32 %v2047_v28, %v2047_v28 }
 0x1bb   : > { %v2031_v26 = vadd.f32 %v1978_v23, %v730_v25  ;;  %1629 = vmatprep.subr.bf16.mxu1 %v1720_v17 }
 0x1bc   : > { %v2035_v35 = vadd.f32 %v1978_v23, %v729_v34  ;;  %1630 = vmatpush3.bf16.msra.mxu1 %v1720_v17  ;;  %v1721_v23 = vld [vmem:[%s2224_s7 + $0x10] sm:$0xff]   ;;  %v2089_v34 = vrot.slane %v850_v10, %v1912_v16 }
 0x1bd   : > { %760 = vadd.xlane.f32.xlu1 %v2031_v26  ;;  %1631 = vmatprep.subr.bf16.mxu1 %v1721_v23  ;;  %v777_v30 = vmul.f32 %v2031_v26, %v2031_v26 }
 0x1be   : > { %758 = vadd.xlane.f32.xlu0 %v2035_v35  ;;  %v776_v31 = vmul.f32 %v2035_v35, %v2035_v35 }
 0x1c0   : > { %1632 = vmatpush3.bf16.msra.mxu1 %v1721_v23 }
 0x1c1   : > { %756 = vadd.xlane.f32.xlu1 %v2044_v20  ;;  %1633 = vmatprep.subr.bf16.mxu1 %v1722_v32 }
 0x1c2   : > { %754 = vadd.xlane.f32.xlu0 %v2047_v28 }
 0x1c4   : > { %1634 = vmatpush3.bf16.msra.mxu1 %v1722_v32 }
 0x1c5   : > { %788 = vadd.xlane.f32.xlu1 %v775_v29  ;;  %1635 = vmatprep.subr.bf16.mxu1 %v1723_v33 }
 0x1c6   : > { %786 = vadd.xlane.f32.xlu0 %v774_v19 }
 0x1c8   : > { %1636 = vmatpush3.bf16.msra.mxu1 %v1723_v33 }
 0x1c9   : > { %792 = vadd.xlane.f32.xlu1 %v777_v30  ;;  %1637 = vmatprep.subr.bf16.mxu1 %v1724_v38 }
 0x1ca   : > { %790 = vadd.xlane.f32.xlu0 %v776_v31  ;;  %v867_v31 = vrot.slane %v863_v13, %v1912_v16 }
 0x1cc   : > { %1638 = vmatpush3.bf16.msra.mxu1 %v1724_v38 }
 0x1cd   : > { %1639 = vmatprep.subr.bf16.mxu1 %v1725_v39 }
 0x1d0   : > { %1640 = vmatpush3.bf16.msra.mxu1 %v1725_v39 }
 0x1d1   : > { %1641 = vmatprep.subr.bf16.mxu1 %v1726_v40 }
 0x1d4   : > { %1642 = vmatpush3.bf16.msra.mxu1 %v1726_v40 }
 0x233   : > { %v751_v42 = vpop.xlane.xlu0 %750 }
 0x234   : > { %v764_v46 = vmul.f32 0.03125, %v751_v42 }
 0x236   : > { %v753_v41 = vpop.xlane.xlu1 %752  ;;  %v804_v52 = vmul.f32 %v764_v46, %v764_v46  ;;  %v836_v18 = vsub.f32 %v1989_v24, %v764_v46 }
 0x237   : > { %v765_v44 = vmul.f32 0.03125, %v753_v41 }
 0x239   : > { %v805_v48 = vmul.f32 %v765_v44, %v765_v44  ;;  %v837_v11 = vsub.f32 %v2000_v55, %v765_v44 }
 0x23a   : > { %v749_v43 = vpop.xlane.xlu1 %748 }
 0x23b   : > { %v747_v45 = vpop.xlane.xlu0 %746  ;;  %v763_v49 = vmul.f32 0.03125, %v749_v43 }
 0x23c   : > { %v762_v53 = vmul.f32 0.03125, %v747_v45 }
 0x23d   : > { %v803_v57 = vmul.f32 %v763_v49, %v763_v49  ;;  %v835_v29 = vsub.f32 %v2006_v63, %v763_v49 }
 0x23e   : > { %v785_v47 = vpop.xlane.xlu1 %784  ;;  %v802_v61 = vmul.f32 %v762_v53, %v762_v53  ;;  %v834_v33 = vsub.f32 %v2009_v0, %v762_v53 }
 0x23f   : > { %v797_v50 = vmul.f32 0.03125, %v785_v47  ;;  %v783_v51 = vpop.xlane.xlu0 %782 }
 0x240   : > { %v796_v54 = vmul.f32 0.03125, %v783_v51 }
 0x241   : > { %v813_v21 = vsub.f32 %v797_v50, %v805_v48 }
 0x242   : > { %v812_v27 = vsub.f32 %v796_v54, %v804_v52  ;;  %v781_v56 = vpop.xlane.xlu1 %780 }
 0x243   : > { %v821_v58 = vadd.f32 1e-06, %v813_v21  ;;  %v795_v59 = vmul.f32 0.03125, %v781_v56  ;;  %v779_v60 = vpop.xlane.xlu0 %778 }
 0x244   : > { %v820_v62 = vadd.f32 1e-06, %v812_v27  ;;  %v794_v1 = vmul.f32 0.03125, %v779_v60 }
 0x245   : > { %1759 = vrsqrt.f32 %v821_v58  ;;  %v811_v2 = vsub.f32 %v795_v59, %v803_v57 }
 0x246   : > { %1761 = vrsqrt.f32 %v820_v62  ;;  %v810_v3 = vsub.f32 %v794_v1, %v802_v61 }
 0x247   : > { %v819_v4 = vadd.f32 1e-06, %v811_v2 }
 0x248   : > { %v818_v5 = vadd.f32 1e-06, %v810_v3 }
 0x249   : > { %1763 = vrsqrt.f32 %v819_v4 }
 0x24a   : > { %1765 = vrsqrt.f32 %v818_v5  ;;  %v761_v7 = vpop.xlane.xlu1 %760 }
 0x24b   : > { %v759_v8 = vpop.xlane.xlu0 %758  ;;  %v769_v19 = vmul.f32 0.03125, %v761_v7 }
 0x24c   : > { %v768_v23 = vmul.f32 0.03125, %v759_v8 }
 0x24d   : > { %v809_v49 = vmul.f32 %v769_v19, %v769_v19  ;;  %v841_v13 = vsub.f32 %v2031_v26, %v769_v19 }
 0x24e   : > { %v757_v12 = vpop.xlane.xlu1 %756  ;;  %v808_v50 = vmul.f32 %v768_v23, %v768_v23 }
 0x24f   : > { %v1760_v15 = vpop.eup %1759  ;;  %v767_v22 = vmul.f32 0.03125, %v757_v12  ;;  %v755_v25 = vpop.xlane.xlu0 %754 }
 0x250   : > { %v1762_v36 = vpop.eup %1761  ;;  %v766_v37 = vmul.f32 0.03125, %v755_v25  ;;  %v845_v14 = vmul.f32 %v1760_v15, %v837_v11  ;;  %v840_v25 = vsub.f32 %v2035_v35, %v768_v23  ;;  %v1727_v23 = vld [vmem:[%s2226_s9] sm:$0xff]  }
 0x251   : > { %v844_v17 = vmul.f32 %v1762_v36, %v836_v18  ;;  %v807_v38 = vmul.f32 %v767_v22, %v767_v22  ;;  %v839_v7 = vsub.f32 %v2044_v20, %v767_v22  ;;  %1651 = vmatprep.subr.bf16.mxu0 %v1727_v23 }
 0x252   : > { %v789_v30 = vpop.xlane.xlu1 %788  ;;  %v858_v41 = vmul.f32 %v2089_v34, %v845_v14  ;;  %v806_v43 = vmul.f32 %v766_v37, %v766_v37  ;;  %v838_v9 = vsub.f32 %v2047_v28, %v766_v37  ;;  %1652 = vmatpush3.bf16.msra.mxu0 %v1727_v23 }
 0x253   : > { %v1764_v32 = vpop.eup %1763  ;;  %v799_v39 = vmul.f32 0.03125, %v789_v30  ;;  %v787_v40 = vpop.xlane.xlu0 %786  ;;  %v857_v46 = vmul.f32 %v2089_v34, %v844_v17 }
 0x254   : > { %v1766_v42 = vpop.eup %1765  ;;  %v798_v44 = vmul.f32 0.03125, %v787_v40  ;;  %v843_v45 = vmul.f32 %v1764_v32, %v835_v29  ;;  %v871_v57 = vadd.f32 %v867_v31, %v858_v41  ;;  %v1728_v40 = vld [vmem:[%s2226_s9 + $0x8] sm:$0xff]   ;;  %v1731_v41 = vld [vmem:[%s2226_s9 + $0x20] sm:$0xff]  }
 0x255   : > { %v815_v47 = vsub.f32 %v799_v39, %v807_v38  ;;  %v842_v48 = vmul.f32 %v1766_v42, %v834_v33  ;;  %v870_v61 = vadd.f32 %v867_v31, %v857_v46  ;;  %1653 = vmatprep.subr.bf16.mxu0 %v1728_v40  ;;  %v1732_v42 = vld [vmem:[%s2226_s9 + $0x28] sm:$0xff]  }
 0x256   : > { %v814_v51 = vsub.f32 %v798_v44, %v806_v43  ;;  %v793_v52 = vpop.xlane.xlu1 %792  ;;  %v856_v54 = vmul.f32 %v2089_v34, %v843_v45  ;;  %1654 = vmatpush3.bf16.msra.mxu0 %v1728_v40  ;;  %v1733_v43 = vld [vmem:[%s2226_s9 + $0x30] sm:$0xff]   ;;  %v1734_v44 = vld [vmem:[%s2226_s9 + $0x38] sm:$0xff]   ;;  %v1735_v45 = vld [vmem:[%s2228_s11] sm:$0xff]  }
 0x257   : > { %v823_v53 = vadd.f32 1e-06, %v815_v47  ;;  %v801_v21 = vmul.f32 0.03125, %v793_v52  ;;  %v791_v27 = vpop.xlane.xlu0 %790  ;;  %v855_v56 = vmul.f32 %v2089_v34, %v842_v48  ;;  %v877_v6 = vpack.c.bf16 %v871_v57, %v870_v61  ;;  %v1736_v46 = vld [vmem:[%s2228_s11 + $0x8] sm:$0xff]   ;;  %1675 = vmatprep.subr.bf16.mxu1 %v1735_v45  ;;  %v1737_v47 = vld [vmem:[%s2228_s11 + $0x10] sm:$0xff]   ;;  %v1738_v48 = vld [vmem:[%s2228_s11 + $0x18] sm:$0xff]  }
 0x258   : > { %v822_v58 = vadd.f32 1e-06, %v814_v51  ;;  %v800_v59 = vmul.f32 0.03125, %v791_v27  ;;  %v869_v60 = vadd.f32 %v867_v31, %v856_v54  ;;  %v896_v51 = vld [vmem:[%s2225_s8] sm:$0x1] }
 0x259   : > { %1767 = vrsqrt.f32 %v823_v53  ;;  %v817_v62 = vsub.f32 %v801_v21, %v809_v49  ;;  %v868_v1 = vadd.f32 %v867_v31, %v855_v56  ;;  %v1739_v49 = vld [vmem:[%s2228_s11 + $0x20] sm:$0xff]   ;;  %v897_v52 = vunpack.c.l.bf16 %v896_v51 }
 0x25a   : > { %1769 = vrsqrt.f32 %v822_v58  ;;  %v816_v2 = vsub.f32 %v800_v59, %v808_v50  ;;  %v1740_v50 = vld [vmem:[%s2228_s11 + $0x28] sm:$0xff]  }
 0x25b   : > { %v825_v3 = vadd.f32 1e-06, %v817_v62  ;;  %v876_v4 = vpack.c.bf16 %v869_v60, %v868_v1  ;;  %v901_v54 = vrot.slane %v897_v52, %v1912_v16 }
 0x25c   : > { %v824_v5 = vadd.f32 1e-06, %v816_v2 }
 0x25d   : > { %1771 = vrsqrt.f32 %v825_v3  ;;  %1643 = vmatprep.mubr.bf16.mxu1 %v876_v4 }
 0x25e   : > { %1773 = vrsqrt.f32 %v824_v5  ;;  %1644 = vmatmul.mubr.bf16.vlgmr.msra.gmra.mrb[0].mxu1 %v877_v6 }
 0x25f   : > { %1676 = vmatpush3.bf16.msra.mxu1 %v1735_v45 }
 0x260   : > { %1677 = vmatprep.subr.bf16.mxu1 %v1736_v46 }
 0x263   : > { %v1768_v8 = vpop.eup %1767  ;;  %1678 = vmatpush3.bf16.msra.mxu1 %v1736_v46 }
 0x264   : > { %v1770_v10 = vpop.eup %1769  ;;  %v847_v11 = vmul.f32 %v1768_v8, %v839_v7  ;;  %1679 = vmatprep.subr.bf16.mxu1 %v1737_v47 }
 0x265   : > { %v846_v12 = vmul.f32 %v1770_v10, %v838_v9 }
 0x266   : > { %v860_v15 = vmul.f32 %v2089_v34, %v847_v11 }
 0x267   : > { %v1772_v18 = vpop.eup %1771  ;;  %v859_v36 = vmul.f32 %v2089_v34, %v846_v12  ;;  %1680 = vmatpush3.bf16.msra.mxu1 %v1737_v47 }
 0x268   : > { %v1774_v14 = vpop.eup %1773  ;;  %v873_v17 = vadd.f32 %v867_v31, %v860_v15  ;;  %v849_v29 = vmul.f32 %v1772_v18, %v841_v13  ;;  %1681 = vmatprep.subr.bf16.mxu1 %v1738_v48 }
 0x269   : > { %v872_v30 = vadd.f32 %v867_v31, %v859_v36  ;;  %v848_v22 = vmul.f32 %v1774_v14, %v840_v25 }
 0x26a   : > { %v862_v32 = vmul.f32 %v2089_v34, %v849_v29 }
 0x26b   : > { %v878_v37 = vpack.c.bf16 %v873_v17, %v872_v30  ;;  %v861_v33 = vmul.f32 %v2089_v34, %v848_v22  ;;  %v1729_v34 = vld [vmem:[%s2226_s9 + $0x10] sm:$0xff]   ;;  %1682 = vmatpush3.bf16.msra.mxu1 %v1738_v48 }
 0x26c   : > { %v875_v38 = vadd.f32 %v867_v31, %v862_v32  ;;  %1655 = vmatprep.subr.bf16.mxu0 %v1729_v34  ;;  %1683 = vmatprep.subr.bf16.mxu1 %v1739_v49 }
 0x26d   : > { %1647 = vmatprep.mubr.bf16.mxu1 %v878_v37  ;;  %v874_v19 = vadd.f32 %v867_v31, %v861_v33  ;;  %1656 = vmatpush3.bf16.msra.mxu0 %v1729_v34  ;;  %v1730_v31 = vld [vmem:[%s2226_s9 + $0x18] sm:$0xff]  }
 0x26e   : > { %1657 = vmatprep.subr.bf16.mxu0 %v1730_v31 }
 0x26f   : > { %v879_v39 = vpack.c.bf16 %v875_v38, %v874_v19  ;;  %1684 = vmatpush3.bf16.msra.mxu1 %v1739_v49 }
 0x270   : > { %1685 = vmatprep.subr.bf16.mxu1 %v1740_v50 }
 0x271   : > { %1648 = vmatmul.mubr.bf16.gmra.mrb[4].mxu1 %v879_v39  ;;  %1658 = vmatpush3.bf16.msra.mxu0 %v1730_v31 }
 0x272   : > { %1659 = vmatprep.subr.bf16.mxu0 %v1731_v41 }
 0x273   : > { %1686 = vmatpush3.bf16.msra.mxu1 %v1740_v50 }
 0x275   : > { %1660 = vmatpush3.bf16.msra.mxu0 %v1731_v41 }
 0x276   : > { %1661 = vmatprep.subr.bf16.mxu0 %v1732_v42 }
 0x279   : > { %1662 = vmatpush3.bf16.msra.mxu0 %v1732_v42 }
 0x27a   : > { %1663 = vmatprep.subr.bf16.mxu0 %v1733_v43 }
 0x27d   : > { %1664 = vmatpush3.bf16.msra.mxu0 %v1733_v43 }
 0x27e   : > { %1665 = vmatprep.subr.bf16.mxu0 %v1734_v44 }
 0x281   : > { %1666 = vmatpush3.bf16.msra.mxu0 %v1734_v44 }
 0x331   : > { %v1645_v53 = vpop.f32.mrb[0].mxu1 }
 0x332   : > { %v2152_v21 = vadd.f32 %v1645_v53, %v901_v54  ;;  %v984_v27 = vpop.f32.mrb[1].mxu1 }
 0x333   : > { %v2154_v56 = vadd.f32 %v984_v27, %v901_v54  ;;  %v1646_v57 = vpop.f32.mrb[2].mxu1 }
 0x334   : > { %v1017_v58 = vmul.f32 %v2152_v21, %v2152_v21  ;;  %v996_v59 = vadd.f32 %v1646_v57, %v901_v54  ;;  %v987_v60 = vpop.f32.mrb[3].mxu1 }
 0x335   : > { %v1015_v61 = vmul.f32 %v2154_v56, %v2154_v56  ;;  %v2160_v62 = vadd.f32 %v987_v60, %v901_v54 }
 0x336   : > { %v1025_v1 = vmul.f32 %v1017_v58, %v2152_v21  ;;  %v1018_v2 = vmul.f32 %v996_v59, %v996_v59 }
 0x337   : > { %v1023_v3 = vmul.f32 %v1015_v61, %v2154_v56  ;;  %v1016_v4 = vmul.f32 %v2160_v62, %v2160_v62 }
 0x338   : > { %v1033_v5 = vmul.f32 0.044715, %v1025_v1  ;;  %v1026_v6 = vmul.f32 %v1018_v2, %v996_v59 }
 0x339   : > { %v1031_v7 = vmul.f32 0.044715, %v1023_v3  ;;  %v1024_v8 = vmul.f32 %v1016_v4, %v2160_v62 }
 0x33a   : > { %v1041_v9 = vadd.f32 %v1033_v5, %v2152_v21  ;;  %v1034_v10 = vmul.f32 0.044715, %v1026_v6 }
 0x33b   : > { %v1039_v11 = vadd.f32 %v1031_v7, %v2154_v56  ;;  %v1032_v12 = vmul.f32 0.044715, %v1024_v8 }
 0x33c   : > { %v1049_v13 = vmul.f32 0.7978846, %v1041_v9  ;;  %v1042_v15 = vadd.f32 %v1034_v10, %v996_v59 }
 0x33d   : > { %v1047_v18 = vmul.f32 0.7978846, %v1039_v11  ;;  %v1040_v25 = vadd.f32 %v1032_v12, %v2160_v62 }
 0x33e   : > { %1775 = vtanh.f32 %v1049_v13  ;;  %v1050_v36 = vmul.f32 0.7978846, %v1042_v15 }
 0x33f   : > { %1777 = vtanh.f32 %v1047_v18  ;;  %v1048_v14 = vmul.f32 0.7978846, %v1040_v25 }
 0x340   : > { %1779 = vtanh.f32 %v1050_v36 }
 0x341   : > { %1781 = vtanh.f32 %v1048_v14 }
 0x344   : > { %v1649_v17 = vpop.f32.mrb[4].mxu1 }
 0x345   : > { %v2170_v29 = vadd.f32 %v1649_v17, %v901_v54  ;;  %v1000_v30 = vpop.f32.mrb[5].mxu1 }
 0x346   : > { %v2172_v22 = vadd.f32 %v1000_v30, %v901_v54  ;;  %v1650_v32 = vpop.f32.mrb[6].mxu1 }
 0x347   : > { %v1021_v37 = vmul.f32 %v2170_v29, %v2170_v29  ;;  %v1012_v33 = vadd.f32 %v1650_v32, %v901_v54  ;;  %v1003_v38 = vpop.f32.mrb[7].mxu1 }
 0x348   : > { %v1776_v19 = vpop.eup %1775  ;;  %v1019_v39 = vmul.f32 %v2172_v22, %v2172_v22  ;;  %v1004_v23 = vadd.f32 %v1003_v38, %v901_v54 }
 0x349   : > { %v1778_v40 = vpop.eup %1777  ;;  %v1065_v34 = vadd.f32 1.0, %v1776_v19  ;;  %v1029_v31 = vmul.f32 %v1021_v37, %v2170_v29  ;;  %v1022_v41 = vmul.f32 %v1012_v33, %v1012_v33 }
 0x34a   : > { %v1780_v42 = vpop.eup %1779  ;;  %v1027_v43 = vmul.f32 %v1019_v39, %v2172_v22  ;;  %v1020_v44 = vmul.f32 %v1004_v23, %v1004_v23  ;;  %v1063_v45 = vadd.f32 1.0, %v1778_v40 }
 0x34b   : > { %v1782_v46 = vpop.eup %1781  ;;  %v1073_v47 = vmul.f32 0.5, %v1065_v34  ;;  %v1066_v48 = vadd.f32 1.0, %v1780_v42  ;;  %v1037_v49 = vmul.f32 0.044715, %v1029_v31  ;;  %v1030_v50 = vmul.f32 %v1022_v41, %v1012_v33  ;;  %v1741_v31 = vld [vmem:[%s2228_s11 + $0x30] sm:$0xff]   ;;  %v1742_v41 = vld [vmem:[%s2228_s11 + $0x38] sm:$0xff]  }
 0x34c   : > { %v1035_v51 = vmul.f32 0.044715, %v1027_v43  ;;  %v1028_v52 = vmul.f32 %v1020_v44, %v1004_v23  ;;  %v1064_v53 = vadd.f32 1.0, %v1782_v46  ;;  %v1071_v27 = vmul.f32 0.5, %v1063_v45  ;;  %1687 = vmatprep.subr.bf16.mxu1 %v1741_v31 }
 0x34d   : > { %v1074_v54 = vmul.f32 0.5, %v1066_v48  ;;  %v1045_v57 = vadd.f32 %v1037_v49, %v2170_v29  ;;  %v1038_v58 = vmul.f32 0.044715, %v1030_v50  ;;  %v1081_v2 = vmul.f32 %v1073_v47, %v2152_v21  ;;  %1688 = vmatpush3.bf16.msra.mxu1 %v1741_v31 }
 0x34e   : > { %v1043_v60 = vadd.f32 %v1035_v51, %v2172_v22  ;;  %v1036_v61 = vmul.f32 0.044715, %v1028_v52  ;;  %v1072_v1 = vmul.f32 0.5, %v1064_v53  ;;  %v1079_v8 = vmul.f32 %v1071_v27, %v2154_v56  ;;  %1689 = vmatprep.subr.bf16.mxu1 %v1742_v41 }
 0x34f   : > { %v1082_v3 = vmul.f32 %v1074_v54, %v996_v59  ;;  %v1053_v4 = vmul.f32 0.7978846, %v1045_v57  ;;  %v1046_v5 = vadd.f32 %v1038_v58, %v1012_v33 }
 0x350   : > { %v1051_v6 = vmul.f32 0.7978846, %v1043_v60  ;;  %v1044_v7 = vadd.f32 %v1036_v61, %v1004_v23  ;;  %v1080_v9 = vmul.f32 %v1072_v1, %v2160_v62 }
 0x351   : > { %v1088_v10 = vpack.c.bf16 %v1082_v3, %v1081_v2  ;;  %1783 = vtanh.f32 %v1053_v4  ;;  %v1054_v11 = vmul.f32 0.7978846, %v1046_v5  ;;  %1690 = vmatpush3.bf16.msra.mxu1 %v1742_v41 }
 0x352   : > { %1785 = vtanh.f32 %v1051_v6  ;;  %v1052_v12 = vmul.f32 0.7978846, %v1044_v7  ;;  %v1087_v13 = vpack.c.bf16 %v1080_v9, %v1079_v8  ;;  %v1254_v6 = vld [vmem:[%s2229_s12] sm:$0x1] }
 0x353   : > { %1787 = vtanh.f32 %v1054_v11  ;;  %v1255_v7 = vunpack.c.l.bf16 %v1254_v6 }
 0x354   : > { %1789 = vtanh.f32 %v1052_v12  ;;  %1667 = vmatprep.mubr.bf16.mxu0 %v1087_v13 }
 0x355   : > { %1668 = vmatmul.mubr.bf16.vlgmr.msra.gmra.mrb[8].mxu0 %v1088_v10  ;;  %v1259_v8 = vrot.slane %v1255_v7, %v1912_v16 }
 0x35b   : > { %v1784_v21 = vpop.eup %1783 }
 0x35c   : > { %v1786_v59 = vpop.eup %1785  ;;  %v1069_v15 = vadd.f32 1.0, %v1784_v21 }
 0x35d   : > { %v1788_v18 = vpop.eup %1787  ;;  %v1067_v25 = vadd.f32 1.0, %v1786_v59 }
 0x35e   : > { %v1790_v36 = vpop.eup %1789  ;;  %v1070_v14 = vadd.f32 1.0, %v1788_v18  ;;  %v1077_v56 = vmul.f32 0.5, %v1069_v15 }
 0x35f   : > { %v1068_v17 = vadd.f32 1.0, %v1790_v36  ;;  %v1075_v62 = vmul.f32 0.5, %v1067_v25 }
 0x360   : > { %v1078_v30 = vmul.f32 0.5, %v1070_v14  ;;  %v1085_v37 = vmul.f32 %v1077_v56, %v2170_v29  ;;  %v1107_v29 = vld [vmem:[%s2227_s10] sm:$0x1] }
 0x361   : > { %v1076_v32 = vmul.f32 0.5, %v1068_v17  ;;  %v1083_v19 = vmul.f32 %v1075_v62, %v2172_v22  ;;  %v1108_v22 = vunpack.c.l.bf16 %v1107_v29 }
 0x362   : > { %v1086_v38 = vmul.f32 %v1078_v30, %v1012_v33 }
 0x363   : > { %v1084_v39 = vmul.f32 %v1076_v32, %v1004_v23  ;;  %v1112_v33 = vrot.slane %v1108_v22, %v1912_v16 }
 0x364   : > { %v1090_v40 = vpack.c.bf16 %v1086_v38, %v1085_v37 }
 0x365   : > { %v1089_v34 = vpack.c.bf16 %v1084_v39, %v1083_v19 }
 0x367   : > { %1671 = vmatprep.mubr.bf16.mxu0 %v1089_v34 }
 0x368   : > { %1672 = vmatmul.mubr.bf16.gmra.mrb[12].mxu0 %v1090_v40 }
 0x428   : > { %v1669_v23 = vpop.f32.mrb[8].mxu0 }
 0x429   : > { %v1204_v42 = vadd.f32 %v1669_v23, %v1112_v33  ;;  %v1195_v43 = vpop.f32.mrb[9].mxu0 }
 0x42a   : > { %v1196_v44 = vadd.f32 %v1195_v43, %v1112_v33  ;;  %v1670_v45 = vpop.f32.mrb[10].mxu0 }
 0x42b   : > { %v1207_v46 = vadd.f32 %v1670_v45, %v1112_v33  ;;  %v1198_v47 = vpop.f32.mrb[11].mxu0  ;;  %v1228_v49 = vadd.f32 %v1204_v42, %v1989_v24 }
 0x42c   : > { %v1199_v48 = vadd.f32 %v1198_v47, %v1112_v33  ;;  %v1226_v51 = vadd.f32 %v1196_v44, %v2009_v0 }
 0x42d   : > { %v1229_v50 = vadd.f32 %v1207_v46, %v2000_v55 }
 0x42e   : > { %v1227_v52 = vadd.f32 %v1199_v48, %v2006_v63 }
 0x42f   : > { %v1235_v53 = vpack.c.bf16 %v1229_v50, %v1228_v49 }
 0x430   : > { %v1234_v27 = vpack.c.bf16 %v1227_v52, %v1226_v51 }
 0x432   : > { %1691 = vmatprep.mubr.bf16.mxu1 %v1234_v27 }
 0x433   : > { %1692 = vmatmul.mubr.bf16.vlgmr.msra.gmra.mrb[8].mxu1 %v1235_v53 }
 0x43b   : > { %v1673_v54 = vpop.f32.mrb[12].mxu0 }
 0x43c   : > { %v1220_v57 = vadd.f32 %v1673_v54, %v1112_v33  ;;  %v1211_v58 = vpop.f32.mrb[13].mxu0 }
 0x43d   : > { %v1212_v60 = vadd.f32 %v1211_v58, %v1112_v33  ;;  %v1674_v61 = vpop.f32.mrb[14].mxu0 }
 0x43e   : > { %v1223_v1 = vadd.f32 %v1674_v61, %v1112_v33  ;;  %v1214_v2 = vpop.f32.mrb[15].mxu0  ;;  %v1232_v24 = vadd.f32 %v1220_v57, %v2035_v35 }
 0x43f   : > { %v1215_v3 = vadd.f32 %v1214_v2, %v1112_v33  ;;  %v1230_v0 = vadd.f32 %v1212_v60, %v2047_v28 }
 0x440   : > { %v1233_v55 = vadd.f32 %v1223_v1, %v2031_v26 }
 0x441   : > { %v1231_v63 = vadd.f32 %v1215_v3, %v2044_v20 }
 0x442   : > { %v1237_v4 = vpack.c.bf16 %v1233_v55, %v1232_v24 }
 0x443   : > { %v1236_v5 = vpack.c.bf16 %v1231_v63, %v1230_v0 }
 0x445   : > { %1695 = vmatprep.mubr.bf16.mxu1 %v1236_v5 }
 0x446   : > { %1696 = vmatmul.mubr.bf16.gmra.mrb[12].mxu1 %v1237_v4 }
 0x506   : > { %v1693_v9 = vpop.f32.mrb[8].mxu1 }
 0x507   : > { %v1342_v35 = vpop.f32.mrb[9].mxu1  ;;  %v1351_v26 = vadd.f32 %v1693_v9, %v1259_v8 }
 0x508   : > { %v1694_v10 = vpop.f32.mrb[10].mxu1  ;;  %v1343_v12 = vadd.f32 %v1342_v35, %v1259_v8 }
 0x509   : > { %v1354_v11 = vadd.f32 %v1694_v10, %v1259_v8  ;;  %v1345_v28 = vpop.f32.mrb[11].mxu1 }
 0x50a   : > { %v1346_v20 = vadd.f32 %v1345_v28, %v1259_v8 }
 0x50b   : > { %v1540_v13 = vpack.c.bf16 %v1354_v11, %v1351_v26 }
 0x50c   : > { %v1535_v21 = vpack.c.bf16 %v1346_v20, %v1343_v12 }
 0x50d   : > { %1552 = vst [vmem:[%s442_s28 + $0x8] sm:$0xff] %v1540_v13  }
 0x50e   : > { %1536 = vst [vmem:[%s442_s28] sm:$0xff] %v1535_v21  }
 0x519   : > { %v1697_v59 = vpop.f32.mrb[12].mxu1 }
 0x51a   : > { %v1358_v15 = vpop.f32.mrb[13].mxu1  ;;  %v1367_v18 = vadd.f32 %v1697_v59, %v1259_v8 }
 0x51b   : > { %v1698_v16 = vpop.f32.mrb[14].mxu1  ;;  %v1359_v14 = vadd.f32 %v1358_v15, %v1259_v8 }
 0x51c   : > { %v1370_v25 = vadd.f32 %v1698_v16, %v1259_v8  ;;  %v1361_v36 = vpop.f32.mrb[15].mxu1 }
 0x51d   : > { %v1362_v56 = vadd.f32 %v1361_v36, %v1259_v8 }
 0x51e   : > { %v1550_v17 = vpack.c.bf16 %v1370_v25, %v1367_v18 }
 0x51f   : > { %v1545_v62 = vpack.c.bf16 %v1362_v56, %v1359_v14 }
 0x520   : > { %1554 = vst [vmem:[%s442_s28 + $0x18] sm:$0xff] %v1550_v17  }
 0x521   : > { %1553 = vst [vmem:[%s442_s28 + $0x10] sm:$0xff] %v1545_v62  }
 0x522 PF: > { %s23_s25 = sadd.s32 1, %s1797_s25  }
 0x523   : > { %p20_p4 = scmp.ge.s32.totalorder %s23_s25, 4  }
 0x525   :  { %22 = sbr.rel (!%p20_p4) target bundleno = 1 (0x1), region = 102 }

</bundles_post_ra>
